<compile_context>
chip_gen: v5e
topology: v5e:2x2
jax: 0.10.0
libtpu: 0.0.40
codegen_flags: <defaults>
</compile_context>

<pallas_src>
import functools

import jax
import jax.numpy as jnp
from jax.experimental import pallas as pl
from jax.experimental.pallas import tpu as pltpu

EPS = 1e-5                               # nn.BatchNorm1d default eps
LANE = 128
MAX_TL = 32768                           # lane-tile upper bound (multiple of 128)
BLOCK_VMEM_BUDGET = 16 * 1024 * 1024     # budget for double-buffered streaming blocks
RESIDENT_VMEM_BUDGET = 8 * 1024 * 1024   # keep whole patch array VMEM-resident below this
VMEM_LIMIT = 32 * 1024 * 1024            # scoped VMEM limit, safe on v5e/v6e/v7x


def _fused_kernel(patches_ref, w_ref, gamma_ref, beta_ref, o_ref,
                  sum_ref, sumsq_ref, scale_ref, shift_ref,
                  *, inv_r, tl, resident):
    p = pl.program_id(0)            # 0 = statistics pass, 1 = normalize pass
    n = pl.program_id(1)            # batch index
    j = pl.program_id(2)            # column tile index
    n_last = pl.num_programs(1) - 1
    j_last = pl.num_programs(2) - 1

    if resident:
        # Whole (N, CK, L_pad) patch array is VMEM-resident; slice the tile manually.
        col = pl.multiple_of(j * tl, LANE)
        patch = patches_ref[n, :, pl.ds(col, tl)]          # (CK, TL)
    else:
        patch = patches_ref[0]                              # (CK, TL)

    # Tiny-M/K matmul; the kernel is HBM/overhead bound, not MXU bound.
    conv = jnp.dot(w_ref[...], patch, preferred_element_type=jnp.float32)  # (C_out, TL)

    @pl.when(p == 0)
    def _stats_pass():
        @pl.when((n == 0) & (j == 0))
        def _():
            sum_ref[...] = jnp.zeros_like(sum_ref)
            sumsq_ref[...] = jnp.zeros_like(sumsq_ref)

        # Padded columns are exact zeros (no conv bias) -> contribute 0 to the sums.
        sum_ref[...] += jnp.sum(conv, axis=1, keepdims=True)
        sumsq_ref[...] += jnp.sum(conv * conv, axis=1, keepdims=True)

        @pl.when((n == n_last) & (j == j_last))
        def _finalize():
            mean = sum_ref[...] * inv_r
            var = sumsq_ref[...] * inv_r - mean * mean      # biased variance (training BN)
            inv_std = jax.lax.rsqrt(var + EPS)
            scale_ref[...] = gamma_ref[...] * inv_std
            shift_ref[...] = beta_ref[...] - mean * scale_ref[...]

    @pl.when(p == 1)
    def _normalize_pass():
        y = conv * scale_ref[...] + shift_ref[...]
        o_ref[0] = jnp.maximum(y, 0.0).astype(o_ref.dtype)


def _patches_per_batch(x, kernel_size, stride, padding):
    """(N, C, L) -> (N, C*K, L_out) patch tensor, rows ordered ci*K + k."""
    N, C, L = x.shape
    xp = jnp.pad(x, ((0, 0), (0, 0), (padding, padding)))
    L_out = (L + 2 * padding - kernel_size) // stride + 1
    # K strided basic slices (no gather).
    taps = [xp[:, :, k:k + stride * (L_out - 1) + 1:stride]   # each (N, C, L_out)
            for k in range(kernel_size)]
    t = jnp.stack(taps, axis=2)                               # (N, C, K, L_out)
    return t.reshape(N, C * kernel_size, L_out), L_out


def silero_vad_block(x, weight, bias, gamma, beta, *, stride,
                     force_streamed=False, max_tl=MAX_TL):
    """x: (N, C_in, L); weight: (C_out, C_in, K); bias/gamma/beta: (C_out,).

    Returns (N, C_out, L_out), matching SileroVadBlock.forward with training-mode
    BatchNorm statistics.  `bias` is accepted for API parity but is mathematically
    cancelled by the BN mean-centering, so it is never used.
    """
    del bias  # per-channel constant -> exactly cancelled by BatchNorm centering
    N, C_in, L = x.shape
    C_out, _, K = weight.shape
    CK = C_in * K

    patches, L_out = _patches_per_batch(x, K, stride, padding=1)
    R = N * L_out                                   # true column count for BN stats

    # Lane-tile sizing from a VMEM budget (double-buffered patch + out blocks, f32).
    per_col_bytes = 2 * (CK + C_out) * 4
    tl_cap = max(LANE, (BLOCK_VMEM_BUDGET // per_col_bytes) // LANE * LANE)
    TL = int(min(max_tl, tl_cap, pl.cdiv(L_out, LANE) * LANE))
    L_pad = pl.cdiv(L_out, TL) * TL
    num_tiles = L_pad // TL

    if L_pad != L_out:
        patches = jnp.pad(patches, ((0, 0), (0, 0), (0, L_pad - L_out)))  # zero cols
    patches = patches.astype(jnp.float32)
    w_mat = weight.reshape(C_out, CK).astype(jnp.float32)

    # Keep the whole patch array VMEM-resident when small: patches read from HBM once.
    resident = (not force_streamed) and (N * CK * L_pad * 4 <= RESIDENT_VMEM_BUDGET)
    if resident:
        patch_spec = pl.BlockSpec((N, CK, L_pad), lambda p, n, j: (0, 0, 0))
    else:
        patch_spec = pl.BlockSpec((1, CK, TL), lambda p, n, j: (n, 0, j))

    w_spec = pl.BlockSpec((C_out, CK), lambda p, n, j: (0, 0))
    vec_spec = pl.BlockSpec((C_out, 1), lambda p, n, j: (0, 0))
    # Pass 0 pins output block (0,0,0): its index never changes during pass 0, so
    # nothing is written back until pass 1 overwrites it with real data.  Pass 1
    # writes every (n, j) output block exactly once, lane-dense, final layout.
    out_spec = pl.BlockSpec((1, C_out, TL), lambda p, n, j: (n * p, 0, j * p))

    kernel = functools.partial(_fused_kernel, inv_r=1.0 / float(R), tl=TL,
                               resident=resident)

    out = pl.pallas_call(
        kernel,
        out_shape=jax.ShapeDtypeStruct((N, C_out, L_pad), x.dtype),
        grid=(2, N, num_tiles),
        in_specs=[patch_spec, w_spec, vec_spec, vec_spec],
        out_specs=out_spec,
        scratch_shapes=[pltpu.VMEM((C_out, 1), jnp.float32)] * 4,
        compiler_params=pltpu.CompilerParams(
            # Carried statistics + pass ordering require a sequential grid; the
            # fused single-launch latency win outweighs losing megacore here.
            dimension_semantics=("arbitrary", "arbitrary", "arbitrary"),
            vmem_limit_bytes=VMEM_LIMIT),
    )(patches, w_mat,
      gamma.reshape(C_out, 1).astype(jnp.float32),
      beta.reshape(C_out, 1).astype(jnp.float32))

    return out if L_pad == L_out else out[:, :, :L_out]


def reference(x, weight, bias, gamma, beta, stride):
    # Pure-JAX reference of the PyTorch forward (training-mode BN), WITH bias.
    conv = jax.lax.conv_general_dilated(
        x, weight, window_strides=(stride,), padding=[(1, 1)],
        dimension_numbers=("NCH", "OIH", "NCH"))
    conv = conv + bias[None, :, None]
    mean = jnp.mean(conv, axis=(0, 2), keepdims=True)
    var = jnp.mean((conv - mean) ** 2, axis=(0, 2), keepdims=True)
    y = (conv - mean) * jax.lax.rsqrt(var + EPS)
    y = y * gamma[None, :, None] + beta[None, :, None]
    return jnp.maximum(y, 0.0)


if __name__ == "__main__":
    key = jax.random.PRNGKey(0)

    def run_case(N, C_in, L, C_out, K, stride, **kw):
        k1, k2, k3 = jax.random.split(jax.random.fold_in(key, L), 3)
        x = jax.random.normal(k1, (N, C_in, L), jnp.float32)
        weight = jax.random.normal(k2, (C_out, C_in, K), jnp.float32) / jnp.sqrt(C_in * K)
        bias = jax.random.normal(k3, (C_out,), jnp.float32) * 0.1
        gamma = jnp.ones((C_out,), jnp.float32)   # BatchNorm1d default weight
        beta = jnp.zeros((C_out,), jnp.float32)   # BatchNorm1d default bias

        out = silero_vad_block(x, weight, bias, gamma, beta, stride=stride, **kw)
        out = jax.block_until_ready(out)
        ref = reference(x, weight, bias, gamma, beta, stride)
        assert out.shape == ref.shape, (out.shape, ref.shape)
        err = float(jnp.max(jnp.abs(out - ref)))
        assert jnp.allclose(out, ref, rtol=1e-3, atol=1e-4), err

    # SileroVadBlock(4, 8, kernel_size=3, stride=2) at small shapes.
    run_case(2, 4, 16, 8, 3, 2)                                      # VMEM-resident path
    run_case(2, 4, 16, 8, 3, 2, force_streamed=True)                 # streamed path
    run_case(2, 4, 300, 8, 3, 2, max_tl=128)                         # resident, multi-tile
    run_case(2, 4, 300, 8, 3, 2, force_streamed=True, max_tl=128)    # streamed, multi-tile
    print("KERNEL_OK")
</pallas_src>

<mosaic_0001>
module attributes {stable_mosaic.version = 11 : i64} {
  func.func @_fused_kernel(%arg0: i32, %arg1: i32, %arg2: i32, %arg3: memref<2x12x128xf32, #tpu.memory_space<vmem>>, %arg4: memref<8x12xf32, #tpu.memory_space<vmem>>, %arg5: memref<8x1xf32, #tpu.memory_space<vmem>>, %arg6: memref<8x1xf32, #tpu.memory_space<vmem>>, %arg7: memref<1x8x128xf32, #tpu.memory_space<vmem>>, %arg8: memref<8x1xf32, #tpu.memory_space<vmem>>, %arg9: memref<8x1xf32, #tpu.memory_space<vmem>>, %arg10: memref<8x1xf32, #tpu.memory_space<vmem>>, %arg11: memref<8x1xf32, #tpu.memory_space<vmem>>) attributes {dimension_semantics = [#tpu.dimension_semantics<arbitrary>, #tpu.dimension_semantics<arbitrary>, #tpu.dimension_semantics<arbitrary>], iteration_bounds = array<i64: 2, 2, 1>, scalar_prefetch = 0 : i64, scratch_operands = 4 : i64, tpu.core_type = #tpu.core_type<tc>, window_params = [{pipeline_mode = #tpu.pipeline_mode<synchronous>, transform_indices = @transform_0, window_bounds = array<i64: 2, 12, 128>}, {pipeline_mode = #tpu.pipeline_mode<synchronous>, transform_indices = @transform_1, window_bounds = array<i64: 8, 12>}, {pipeline_mode = #tpu.pipeline_mode<synchronous>, transform_indices = @transform_2, window_bounds = array<i64: 8, 1>}, {pipeline_mode = #tpu.pipeline_mode<synchronous>, transform_indices = @transform_3, window_bounds = array<i64: 8, 1>}, {transform_indices = @transform_4, window_bounds = array<i64: 1, 8, 128>}]} {
    %c128_i32 = arith.constant 128 : i32
    %0 = arith.muli %arg2, %c128_i32 : i32
    %1 = tpu.assume_multiple %0, 128 : i32
    %2 = arith.index_cast %arg1 : i32 to index
    %c0 = arith.constant 0 : index
    %3 = arith.index_cast %1 : i32 to index
    %4 = vector.load %arg3[%2, %c0, %3] : memref<2x12x128xf32, #tpu.memory_space<vmem>>, vector<1x12x128xf32>
    %5 = vector.shape_cast %4 : vector<1x12x128xf32> to vector<12x128xf32>
    %c0_0 = arith.constant 0 : index
    %c0_1 = arith.constant 0 : index
    %6 = vector.load %arg4[%c0_0, %c0_1] : memref<8x12xf32, #tpu.memory_space<vmem>>, vector<8x12xf32>
    %cst = arith.constant dense<0.000000e+00> : vector<8x128xf32>
    %7 = tpu.matmul %6, %5, %cst {dimension_numbers = #tpu.dot_dimension_numbers<[1], [0], [0], [1], [0, 0, 1, 1], [], []>} : vector<8x12xf32>, vector<12x128xf32>, vector<8x128xf32> -> vector<8x128xf32>
    %c0_i32 = arith.constant 0 : i32
    %8 = arith.cmpi eq, %arg0, %c0_i32 : i32
    %9 = arith.extui %8 : i1 to i32
    %c0_i32_2 = arith.constant 0 : i32
    %10 = arith.cmpi ne, %9, %c0_i32_2 : i32
    scf.if %10 {
      %c0_i32_4 = arith.constant 0 : i32
      %14 = arith.cmpi eq, %arg1, %c0_i32_4 : i32
      %c0_i32_5 = arith.constant 0 : i32
      %15 = arith.cmpi eq, %arg2, %c0_i32_5 : i32
      %16 = arith.andi %14, %15 : i1
      %17 = arith.extui %16 : i1 to i32
      %c0_i32_6 = arith.constant 0 : i32
      %18 = arith.cmpi ne, %17, %c0_i32_6 : i32
      scf.if %18 {
        %cst_20 = arith.constant 0.000000e+00 : f32
        %35 = vector.broadcast %cst_20 : f32 to vector<8x1xf32>
        %c0_21 = arith.constant 0 : index
        %c0_22 = arith.constant 0 : index
        %36 = vector.load %arg8[%c0_21, %c0_22] : memref<8x1xf32, #tpu.memory_space<vmem>>, vector<8x1xf32>
        tpu.vector_store %arg8[%c0_21, %c0_22], %35 {strides = array<i32>} : memref<8x1xf32, #tpu.memory_space<vmem>>, vector<8x1xf32>,
        %cst_23 = arith.constant 0.000000e+00 : f32
        %37 = vector.broadcast %cst_23 : f32 to vector<8x1xf32>
        %c0_24 = arith.constant 0 : index
        %c0_25 = arith.constant 0 : index
        %38 = vector.load %arg9[%c0_24, %c0_25] : memref<8x1xf32, #tpu.memory_space<vmem>>, vector<8x1xf32>
        tpu.vector_store %arg9[%c0_24, %c0_25], %37 {strides = array<i32>} : memref<8x1xf32, #tpu.memory_space<vmem>>, vector<8x1xf32>,
      } else {
      }
      %c0_7 = arith.constant 0 : index
      %c0_8 = arith.constant 0 : index
      %19 = vector.load %arg8[%c0_7, %c0_8] : memref<8x1xf32, #tpu.memory_space<vmem>>, vector<8x1xf32>
      %cst_9 = arith.constant dense<0.000000e+00> : vector<8xf32>
      %20 = vector.multi_reduction <add>, %7, %cst_9 [1] : vector<8x128xf32> to vector<8xf32>
      %21 = vector.shape_cast %20 : vector<8xf32> to vector<8x1xf32>
      %22 = arith.addf %19, %21 : vector<8x1xf32>
      %c0_10 = arith.constant 0 : index
      %c0_11 = arith.constant 0 : index
      %23 = vector.load %arg8[%c0_10, %c0_11] : memref<8x1xf32, #tpu.memory_space<vmem>>, vector<8x1xf32>
      tpu.vector_store %arg8[%c0_10, %c0_11], %22 {strides = array<i32>} : memref<8x1xf32, #tpu.memory_space<vmem>>, vector<8x1xf32>,
      %c0_12 = arith.constant 0 : index
      %c0_13 = arith.constant 0 : index
      %24 = vector.load %arg9[%c0_12, %c0_13] : memref<8x1xf32, #tpu.memory_space<vmem>>, vector<8x1xf32>
      %25 = arith.mulf %7, %7 : vector<8x128xf32>
      %cst_14 = arith.constant dense<0.000000e+00> : vector<8xf32>
      %26 = vector.multi_reduction <add>, %25, %cst_14 [1] : vector<8x128xf32> to vector<8xf32>
      %27 = vector.shape_cast %26 : vector<8xf32> to vector<8x1xf32>
      %28 = arith.addf %24, %27 : vector<8x1xf32>
      %c0_15 = arith.constant 0 : index
      %c0_16 = arith.constant 0 : index
      %29 = vector.load %arg9[%c0_15, %c0_16] : memref<8x1xf32, #tpu.memory_space<vmem>>, vector<8x1xf32>
      tpu.vector_store %arg9[%c0_15, %c0_16], %28 {strides = array<i32>} : memref<8x1xf32, #tpu.memory_space<vmem>>, vector<8x1xf32>,
      %c1_i32_17 = arith.constant 1 : i32
      %30 = arith.cmpi eq, %arg1, %c1_i32_17 : i32
      %c0_i32_18 = arith.constant 0 : i32
      %31 = arith.cmpi eq, %arg2, %c0_i32_18 : i32
      %32 = arith.andi %30, %31 : i1
      %33 = arith.extui %32 : i1 to i32
      %c0_i32_19 = arith.constant 0 : i32
      %34 = arith.cmpi ne, %33, %c0_i32_19 : i32
      scf.if %34 {
        %c0_20 = arith.constant 0 : index
        %c0_21 = arith.constant 0 : index
        %35 = vector.load %arg8[%c0_20, %c0_21] : memref<8x1xf32, #tpu.memory_space<vmem>>, vector<8x1xf32>
        %cst_22 = arith.constant 6.250000e-02 : f32
        %36 = vector.broadcast %cst_22 : f32 to vector<8x1xf32>
        %37 = arith.mulf %35, %36 : vector<8x1xf32>
        %c0_23 = arith.constant 0 : index
        %c0_24 = arith.constant 0 : index
        %38 = vector.load %arg9[%c0_23, %c0_24] : memref<8x1xf32, #tpu.memory_space<vmem>>, vector<8x1xf32>
        %cst_25 = arith.constant 6.250000e-02 : f32
        %39 = vector.broadcast %cst_25 : f32 to vector<8x1xf32>
        %40 = arith.mulf %38, %39 : vector<8x1xf32>
        %41 = arith.mulf %37, %37 : vector<8x1xf32>
        %42 = arith.subf %40, %41 : vector<8x1xf32>
        %cst_26 = arith.constant 9.99999974E-6 : f32
        %43 = vector.broadcast %cst_26 : f32 to vector<8x1xf32>
        %44 = arith.addf %42, %43 : vector<8x1xf32>
        %45 = math.rsqrt %44 : vector<8x1xf32>
        %c0_27 = arith.constant 0 : index
        %c0_28 = arith.constant 0 : index
        %46 = vector.load %arg5[%c0_27, %c0_28] : memref<8x1xf32, #tpu.memory_space<vmem>>, vector<8x1xf32>
        %47 = arith.mulf %46, %45 : vector<8x1xf32>
        %c0_29 = arith.constant 0 : index
        %c0_30 = arith.constant 0 : index
        %48 = vector.load %arg10[%c0_29, %c0_30] : memref<8x1xf32, #tpu.memory_space<vmem>>, vector<8x1xf32>
        tpu.vector_store %arg10[%c0_29, %c0_30], %47 {strides = array<i32>} : memref<8x1xf32, #tpu.memory_space<vmem>>, vector<8x1xf32>,
        %c0_31 = arith.constant 0 : index
        %c0_32 = arith.constant 0 : index
        %49 = vector.load %arg6[%c0_31, %c0_32] : memref<8x1xf32, #tpu.memory_space<vmem>>, vector<8x1xf32>
        %c0_33 = arith.constant 0 : index
        %c0_34 = arith.constant 0 : index
        %50 = vector.load %arg10[%c0_33, %c0_34] : memref<8x1xf32, #tpu.memory_space<vmem>>, vector<8x1xf32>
        %51 = arith.mulf %37, %50 : vector<8x1xf32>
        %52 = arith.subf %49, %51 : vector<8x1xf32>
        %c0_35 = arith.constant 0 : index
        %c0_36 = arith.constant 0 : index
        %53 = vector.load %arg11[%c0_35, %c0_36] : memref<8x1xf32, #tpu.memory_space<vmem>>, vector<8x1xf32>
        tpu.vector_store %arg11[%c0_35, %c0_36], %52 {strides = array<i32>} : memref<8x1xf32, #tpu.memory_space<vmem>>, vector<8x1xf32>,
      } else {
      }
    } else {
    }
    %c1_i32 = arith.constant 1 : i32
    %11 = arith.cmpi eq, %arg0, %c1_i32 : i32
    %12 = arith.extui %11 : i1 to i32
    %c0_i32_3 = arith.constant 0 : i32
    %13 = arith.cmpi ne, %12, %c0_i32_3 : i32
    scf.if %13 {
      %c0_4 = arith.constant 0 : index
      %c0_5 = arith.constant 0 : index
      %14 = vector.load %arg10[%c0_4, %c0_5] : memref<8x1xf32, #tpu.memory_space<vmem>>, vector<8x1xf32>
      %15 = vector.broadcast %14 : vector<8x1xf32> to vector<8x128xf32>
      %16 = arith.mulf %7, %15 : vector<8x128xf32>
      %c0_6 = arith.constant 0 : index
      %c0_7 = arith.constant 0 : index
      %17 = vector.load %arg11[%c0_6, %c0_7] : memref<8x1xf32, #tpu.memory_space<vmem>>, vector<8x1xf32>
      %18 = vector.broadcast %17 : vector<8x1xf32> to vector<8x128xf32>
      %19 = arith.addf %16, %18 : vector<8x128xf32>
      %cst_8 = arith.constant 0.000000e+00 : f32
      %20 = vector.broadcast %cst_8 : f32 to vector<8x128xf32>
      %21 = arith.maximumf %19, %20 : vector<8x128xf32>
      %c0_9 = arith.constant 0 : index
      %c0_10 = arith.constant 0 : index
      %c0_11 = arith.constant 0 : index
      %22 = vector.load %arg7[%c0_9, %c0_10, %c0_11] : memref<1x8x128xf32, #tpu.memory_space<vmem>>, vector<1x8x128xf32>
      %23 = vector.shape_cast %22 : vector<1x8x128xf32> to vector<8x128xf32>
      %24 = vector.shape_cast %21 : vector<8x128xf32> to vector<1x8x128xf32>
      tpu.vector_store %arg7[%c0_9, %c0_10, %c0_11], %24 {strides = array<i32>} : memref<1x8x128xf32, #tpu.memory_space<vmem>>, vector<1x8x128xf32>,
    } else {
    }
    return
  }
  func.func @transform_0(%arg0: i32, %arg1: i32, %arg2: i32) -> (i32, i32, i32) {
    %c0_i32 = arith.constant 0 : i32
    %c0_i32_0 = arith.constant 0 : i32
    %c0_i32_1 = arith.constant 0 : i32
    %c0_i32_2 = arith.constant 0 : i32
    return %c0_i32, %c0_i32_0, %c0_i32_1 : i32, i32, i32
  }
  func.func @transform_1(%arg0: i32, %arg1: i32, %arg2: i32) -> (i32, i32) {
    %c0_i32 = arith.constant 0 : i32
    %c0_i32_0 = arith.constant 0 : i32
    %c0_i32_1 = arith.constant 0 : i32
    return %c0_i32, %c0_i32_0 : i32, i32
  }
  func.func @transform_2(%arg0: i32, %arg1: i32, %arg2: i32) -> (i32, i32) {
    %c0_i32 = arith.constant 0 : i32
    %c0_i32_0 = arith.constant 0 : i32
    %c0_i32_1 = arith.constant 0 : i32
    return %c0_i32, %c0_i32_0 : i32, i32
  }
  func.func @transform_3(%arg0: i32, %arg1: i32, %arg2: i32) -> (i32, i32) {
    %c0_i32 = arith.constant 0 : i32
    %c0_i32_0 = arith.constant 0 : i32
    %c0_i32_1 = arith.constant 0 : i32
    return %c0_i32, %c0_i32_0 : i32, i32
  }
  func.func @transform_4(%arg0: i32, %arg1: i32, %arg2: i32) -> (i32, i32, i32) {
    %0 = arith.muli %arg1, %arg0 : i32
    %1 = arith.muli %arg2, %arg0 : i32
    %c0_i32 = arith.constant 0 : i32
    %c0_i32_0 = arith.constant 0 : i32
    return %0, %c0_i32, %1 : i32, i32, i32
  }
}

</mosaic_0001>

<bundles_post_ra>
// kernel: tpu_custom_call.1
= control target key start
LH: loop header
LB: loop body
LE: loop exit
PB: predicated region body
PF: predicated region fallthrough
CT: control target
= control target key end

     0   :  { %9 = vsyncpa [#allocation7], 0  ;;  %s763_s0 = inlined_call_operand.vmem [shape: f32[2,12,128], index: 0, kind: input, shape index: {}]   ;;  %s764_s1 = inlined_call_operand.vmem [shape: f32[8,12], index: 1, kind: input, shape index: {}]   ;;  %s765_s2 = inlined_call_operand.vmem [shape: f32[8,1], index: 2, kind: input, shape index: {}]   ;;  %s766_s3 = inlined_call_operand.vmem [shape: f32[8,1], index: 3, kind: input, shape index: {}]   ;;  %s767_s4 = inlined_call_operand.hbm [shape: f32[2,8,128], index: 4, kind: output, shape index: {}]  }
   0x1   :  { %11 = vsyncpa [#allocation7 + $0x1], 0  ;;  %s616_s15 = smov 0   ;;  %s618_s16 = smov 0  }
   0x2   :  { %s620_s17 = smov 0   ;;  %s622_s18 = smov 0  }
   0x3   :  { %s624_s19 = smov 0   ;;  %s626_s20 = smov 0  }
   0x4   :  { %s628_s21 = smov 0   ;;  %s630_s22 = smov 0  }
   0x5 LB: > { %s399_s23 = sadd.s32 4294967295, %s587_s22   ;;  %s400_s24 = sadd.s32 4294967294, %s587_s22   ;;  %s587_s22 = sphi %s630_s22, %s17_s22   ;;  %s583_s21 = sphi %s628_s21, %s776_s21   ;;  %s579_s20 = sphi %s626_s20, %s775_s20   ;;  %s575_s19 = sphi %s624_s19, %s774_s19   ;;  %s571_s18 = sphi %s622_s18, %s773_s18   ;;  %s567_s17 = sphi %s620_s17, %s772_s17   ;;  %s563_s16 = sphi %s618_s16, %s771_s16   ;;  %s559_s15 = sphi %s616_s15, %s770_s15  }
   0x6   : > { %s32_s25 = sadd.s32 1, %s579_s20  ;;  %s36_s26 = sadd.s32 1, %s583_s21 }
   0x7   : > { %p34_p0 = scmp.ge.s32.totalorder %s32_s25, 2  ;;  %s124_s27 = smul.u32 %s579_s20, %s583_s21 }
   0x8   : > { %p143_p1 = scmp.ne.s32.totalorder %s567_s17, %s563_s16  ;;  %p144_p2 = scmp.eq.s32.totalorder %s399_s23, 3 }
   0x9   : > { %s778_s25 = smov (%p34_p0, %s32_s25), 0  ;;  %s780_s26 = smov (!%p34_p0, %s36_s26), %s583_s21 }
   0xa   : > { %p149_p3 = scmp.ne.s32.totalorder %s563_s16, %s559_s15  ;;  %p38_p4 = scmp.ge.s32.totalorder %s780_s26, 2 }
   0xb   : > { %p150_p5 = scmp.eq.s32.totalorder %s400_s24, 3  ;;  %p669_p6 = por %p144_p2, %p143_p1 }
   0xc   : > { %p402_p7 = scmp.ge.s32.totalorder %s587_s22, 1  ;;  %s782_s26 = smov (%p38_p4, %s780_s26), 0 }
   0xd   : > { %p676_p8 = por %p150_p5, %p149_p3  ;;  %p180_p9 = scmp.lt.s32.totalorder %s587_s22, 5 }
   0xe   : > { %s126_s30 = smul.u32 %s782_s26, %s778_s25  ;;  %s133_s6 = sadd.s32 1, %s567_s17 }
   0xf   : > { %p181_p10 = pnand %p402_p7, %p180_p9 }
  0x10   : > { %s128_s5 = ssub.s32 %s124_s27, %s126_s30  ;;  %s198_s8 = sand.u32 (!%p181_p10), 1, %s563_s16  }
  0x11   : > { %p131_p11 = scmp.eq.s32.totalorder %s128_s5, 0  ;;  %184 = sbr.rel (%p181_p10) target bundleno = 484 (0x1e4), region = 36 }
  0x12   : > { %s404_s9 = sshll.u32 (!%p181_p10), %s571_s18, 4  ;;  %s691_s10 = sshll.u32 (!%p181_p10), %s198_s8, 3 }
  0x13   : > { %s685_s7 = scalar_select %p131_p11, %s567_s17, %s133_s6  }
  0x14   : > { %s208_s13 = scalar_lea.vmem (!%p181_p10), %s763_s0, %s404_s9  ;;  %s200_s24 = scalar_lea.vmem (!%p181_p10), [#allocation6], %s691_s10 }
  0x15   : > { %p407_p12 = scmp.ne.s32.totalorder (!%p181_p10), %s575_s19, 0 }
  0x16   : > { %vm216_vm0 = vcmask 1043456   ;;  %v210_v0 = vld [vmem:[%s208_s13 + $0x8] sm:$0xf]  ;;  %v209_v1 = vld [vmem:[%s208_s13] sm:$0xff]  ;;  %vm212_vm1 = vcmask 97280   ;;  %p244_p13 = scmp.eq.s32.totalorder (!%p407_p12), %s571_s18, 0 }
  0x17   : > { %405 = vmatpush.msk.msra.mxu0 %vm216_vm0, %v210_v0  ;;  %v211_v2 = vld [vmem:[%s764_s1] sm:$0xff] }
  0x19   : > { %235 = vmatpush.msra.mxu0 %v209_v1 }
  0x1a   : > { %406 = vmatmul.msk.f32.vlgmr.msra.gmra.mxu0 %vm212_vm1, %v211_v2 }
  0x93   : > { %243 = sbr.rel (%p407_p12) target bundleno = 330 (0x14a), region = 40 }
  0x97   : > { %v237_v3 = vpop.f32.mrf.mxu0 }
  0x98   : > { %249 = sbr.rel (!%p244_p13) target bundleno = 157 (0x9d), region = 44  ;;  %vm250_vm2 = vcmask (%p244_p13), 7168   ;;  %v589_v4 = vmov (%p244_p13), 0.0  }
  0x99   : > { %251 = vst.msk [vmem:[#allocation2] sm:$0xff] (%p244_p13), %vm250_vm2, %v589_v4 }
  0x9a   : > { %252 = vst.msk [vmem:[#allocation3] sm:$0xff] (%p244_p13), %vm250_vm2, %v589_v4 }
  0x9d PF: > { %254 = vadd.xlane.f32.xlu0 %v237_v3  ;;  %p265_p0 = scmp.eq.s32.totalorder %s571_s18, 1  ;;  %v260_v5 = vmul.f32 %v237_v3, %v237_v3  ;;  %vm257_vm3 = vcmask 7168  }
  0x9e   : > { %v287_v25 = vld [vmem:[%s765_s2] sm:$0xff] (%p265_p0) }
  0x9f   : > { %v290_v28 = vld [vmem:[%s766_s3] sm:$0xff] (%p265_p0) }
  0xa0   : > { %v253_v6 = vld [vmem:[#allocation2] sm:$0xff] }
  0xa1   : > { %v259_v9 = vld [vmem:[#allocation3] sm:$0xff] }
  0xa5   : > { %261 = vadd.xlane.f32.xlu0 %v260_v5 }
 0x110   : > { %v255_v7 = vpop.xlane.xlu0 %254 }
 0x111   : > { %v256_v8 = vadd.f32 %v255_v7, %v253_v6 }
 0x113   : > { %258 = vst.msk [vmem:[#allocation2] sm:$0xff] %vm257_vm3, %v256_v8 }
 0x117   : > { %269 = sbr.rel (!%p265_p0) target bundleno = 330 (0x14a), region = 48 }
 0x118   : > { %v262_v10 = vpop.xlane.xlu0 %261 }
 0x119   : > { %v263_v11 = vadd.f32 %v262_v10, %v259_v9 }
 0x11a   : > { %v270_v12 = vld [vmem:[#allocation2] sm:$0xff] (%p265_p0) }
 0x11b   : > { %264 = vst.msk [vmem:[#allocation3] sm:$0xff] %vm257_vm3, %v263_v11  ;;  %v271_v14 = vmul.f32 (%p265_p0), 0.0625, %v270_v12 }
 0x11d   : > { %v274_v16 = vmul.f32 %v271_v14, %v271_v14 }
 0x122   : > { %v272_v13 = vld [vmem:[#allocation3] sm:$0xff] }
 0x123   : > { %v273_v15 = vmul.f32 0.0625, %v272_v13 }
 0x125   : > { %v275_v17 = vsub.f32 %v273_v15, %v274_v16 }
 0x127   : > { %v276_v18 = vadd.f32 1e-05, %v275_v17 }
 0x129   : > { %490 = vrsqrt.f32 %v276_v18  ;;  %vm283_vm4 = vweird.f32 %v276_v18 }
 0x12f   : > { %v491_v19 = vpop.eup %490 }
 0x130   : > { %v278_v20 = vmul.f32 %v491_v19, %v276_v18  ;;  %vm284_vm5 = vweird.f32 %v491_v19 }
 0x131   : > { %vm285_vm6 = vmor %vm283_vm4, %vm284_vm5 }
 0x132   : > { %v279_v21 = vmul.f32 %v491_v19, %v278_v20 }
 0x134   : > { %v280_v22 = vmul.f32 0.5, %v279_v21 }
 0x136   : > { %v281_v23 = vsub.f32 1.5, %v280_v22 }
 0x138   : > { %v282_v24 = vmul.f32 %v491_v19, %v281_v23 }
 0x13a   : > { %v286_v26 = vsel %vm285_vm6, %v491_v19, %v282_v24 }
 0x13b   : > { %v288_v27 = vmul.f32 %v287_v25, %v286_v26 }
 0x13d   : > { %289 = vst.msk [vmem:[#allocation4] sm:$0xff] %vm257_vm3, %v288_v27 }
 0x144   : > { %v291_v29 = vld [vmem:[#allocation4] sm:$0xff] }
 0x145   : > { %v292_v30 = vmul.f32 %v291_v29, %v271_v14 }
 0x147   : > { %v293_v31 = vsub.f32 %v290_v28, %v292_v30 }
 0x149   : > { %294 = vst.msk [vmem:[#allocation5] sm:$0xff] %vm257_vm3, %v293_v31 }
 0x14a PF: > { %p410_p1 = scmp.ne.s32.totalorder %s575_s19, 1 }
 0x14c   : > { %298 = sbr.rel (%p410_p1) target bundleno = 467 (0x1d3), region = 52 }
 0x151   : > { %v299_v32 = vld [vmem:[#allocation4] sm:$0xff]  ;;  %v590_v33 = vmov 0   ;;  %v306_v34 = vld [vmem:[#allocation5] sm:$0xff] }
 0x152   : > { %492 = vset.pattern.permute.xlu0 %v590_v33 }
 0x153   : > { %302 = vperm.xlu0 %492, %v299_v32  }
 0x15b   : > { %309 = vperm.xlu0 %492, %v306_v34  }
 0x1c5   : > { %v303_v35 = vpop.permute.xlu0 %302 }
 0x1c6   : > { %v305_v36 = vmul.f32 %v303_v35, %v237_v3 }
 0x1cd   : > { %v310_v37 = vpop.permute.xlu0 %309 }
 0x1ce   : > { %v312_v38 = vadd.f32 %v310_v37, %v305_v36 }
 0x1d0   : > { %v313_v39 = vmax.f32 %v312_v38, 0.0 }
 0x1d2   : > { %314 = vst [vmem:[%s200_s24] sm:$0xff] %v313_v39 }
 0x1d3 PF: > { %s323_s9 = smul.u32 %s571_s18, %s575_s19  ;;  %s331_s11 = sshll.u32 %s200_s24, 4  ;;  %s332_s11 = int_to_ptr.vmem [resolvable:$true] %s331_s11 }
 0x1d4   : > { %s316_s30 = scalar_lea.sflag [#allocation7], %s198_s8  ;;  %s513_s10 = scalar_lea.hbm %s767_s4, 16 }
 0x1d5   : > { %s412_s12 = sshll.u32 %s323_s9, 3 }
 0x1d6   : > { %s329_s23 = scalar_lea.hbm %s767_s4, %s412_s12 }
 0x1d7   : > { %s333_s27 = sshll.u32 %s329_s23, 4  ;;  %s334_s27 = int_to_ptr.hbm [resolvable:$true] %s333_s27 }
 0x1d8   : > { %s507_s5 = sshra.s32 %s334_s27, 4  ;;  %s508_s5 = int_to_ptr.hbm [resolvable:$true] %s507_s5 }
 0x1d9   : > { %s509_s6 = scalar_lea.hbm %s508_s5, 8  ;;  %p514_p5 = scmp.lt.s32.totalorder %s508_s5, %s767_s4 }
 0x1da   : > { %p510_p2 = scmp.ne.s32.totalorder %s508_s5, %s509_s6  ;;  %p515_p7 = scmp.lt.s32.totalorder %s513_s10, %s509_s6 }
 0x1dc   : > { %p511_p3 = pnand %p510_p2, %p669_p6  ;;  %p516_p9 = por %p515_p7, %p514_p5 }
 0x1de   : > { %p512_p4 = pneg %p511_p3 }
 0x1e0   : > { %p517_p10 = pnand %p516_p9, %p512_p4 }
 0x1e2   : > { %520 = shalt.err (!%p517_p10)
}
 0x1e3   : > { %417 = dma.vmem_to_hbm [thread:$0]  (%p669_p6), %s332_s11, 128, %s334_s27, %s316_s30  }
 0x1e4 PF: > { %p423_p11 = scmp.ge.s32.totalorder %s587_s22, 2  ;;  %s345_s8 = sand.u32 1, %s559_s15  }
 0x1e5   : > { %s346_s12 = scalar_lea.sflag [#allocation7], %s345_s8 }
 0x1e6   : > { %p420_p12 = pnand %p423_p11, %p676_p8 }
 0x1e8   : > { %p421_p13 = pneg %p420_p12 }
 0x1ea   : > { %554 = dma.done.wait (%p421_p13), %s346_s12, 128  }
 0x1eb   : > { %556 = vsyncadd (%p421_p13), %s346_s12, 4294967168  ;;  %s17_s22 = sadd.s32 1, %s587_s22   ;;  %s770_s15 = smov %s563_s16 }
 0x1ec   : > { %p14_p0 = scmp.ge.s32.totalorder %s17_s22, 6   ;;  %s771_s16 = smov %s567_s17 }
 0x1ed   : > { %s772_s17 = smov %s685_s7  ;;  %s773_s18 = smov %s579_s20 }
 0x1ee   : > { %s774_s19 = smov %s583_s21  ;;  %s775_s20 = smov %s778_s25 }
 0x1ef   : > { %s776_s21 = smov %s782_s26  ;;  %16 = sbr.rel (!%p14_p0) target bundleno = 5 (0x5), region = 85 }
 0x1f4   :  { %352 = vsyncpa [#allocation7], 1 }
 0x1f5   :  { %354 = vsyncpa [#allocation7 + $0x1], 1 }

</bundles_post_ra>
